<compile_context>
chip_gen: v7x
topology: tpu7x:2x2x1
jax: 0.10.0
libtpu: 0.0.40
codegen_flags: <defaults>
</compile_context>

<pallas_src>
import jax
import jax.numpy as jnp
from jax.experimental import pallas as pl
from jax.experimental.pallas import tpu as pltpu

_LANE_WIDTHS = (512, 256, 128)   # candidate last-dim widths, all multiples of 128
_BLOCK_ELEMS = 256 * 1024        # ~1 MiB per f32 input block per grid step
_PALLAS_MIN_ELEMS = 1 << 20      # below this, plain jnp.stack beats kernel launch overhead


def _stack_kernel(lo_ref, up_ref, o_ref):
    # lo_ref / up_ref: (rows_blk, C) sublane/lane-dense tiles of the flattened
    # lower / upper bounds.  o_ref: (2, rows_blk, C) tile of the stacked output.
    o_ref[0] = lo_ref[...]
    o_ref[1] = up_ref[...]


def _stack_flat_pallas(lower_flat, upper_flat):
    """(N,), (N,) -> (2, N) == jnp.stack([lower, upper], 0), via a Pallas copy kernel."""
    n = lower_flat.shape[0]
    dtype = lower_flat.dtype

    # Pick a lane width that divides N so no host-side pad/slice (which would
    # multiply HBM traffic for a pure copy) is needed.
    # TODO(synk): replace the pad fallback with an in-kernel masked store on the
    # ragged tail to keep odd N at the 4N-bytes roofline as well.
    c = next((w for w in _LANE_WIDTHS if n % w == 0), None)
    padded = False
    if c is None:
        c = 128
        n_pad = ((n + c - 1) // c) * c
        lower_flat = jnp.pad(lower_flat, (0, n_pad - n))
        upper_flat = jnp.pad(upper_flat, (0, n_pad - n))
        padded = True
    else:
        n_pad = n

    r = n_pad // c                           # total rows of the (r, c) slab
    r_tile = _BLOCK_ELEMS // c               # rows per block (multiple of 8)
    rows_blk = r_tile if r >= r_tile else r  # full-extent block when slab is small
    grid = (pl.cdiv(r, rows_blk),)

    lo2d = lower_flat.reshape(r, c)
    up2d = upper_flat.reshape(r, c)

    out3d = pl.pallas_call(
        _stack_kernel,
        out_shape=jax.ShapeDtypeStruct((2, r, c), dtype),
        grid_spec=pltpu.PrefetchScalarGridSpec(
            num_scalar_prefetch=0,
            grid=grid,
            in_specs=[
                pl.BlockSpec((rows_blk, c), lambda i: (i, 0)),
                pl.BlockSpec((rows_blk, c), lambda i: (i, 0)),
            ],
            out_specs=pl.BlockSpec((2, rows_blk, c), lambda i: (0, i, 0)),
        ),
        compiler_params=pltpu.CompilerParams(
            dimension_semantics=("parallel",),
        ),
    )(lo2d, up2d)

    out = out3d.reshape(2, n_pad)  # row-major reshape back to (2, N): free
    if padded:
        out = out[:, :n]
    return out


class FlattenTransformer:
    """JAX/Pallas port of the PyTorch FlattenTransformer (forward pass only)."""

    def __init__(self, last=None, idx=None, sub_id=None, force_pallas=False):
        self.last = last
        self.idx = idx
        self.sub_id = sub_id
        self.force_pallas = force_pallas
        # TODO(synk): _back_sub (clamp-matmul back-substitution) is not part of
        # forward(); not ported here.

    def forward(self, bounds, assignment):
        lower = jnp.reshape(bounds[0], (-1,))  # row-major flatten, same as torch
        upper = jnp.reshape(bounds[1], (-1,))
        n = lower.shape[0]
        if self.force_pallas or n >= _PALLAS_MIN_ELEMS:
            b = _stack_flat_pallas(lower, upper)
        else:
            # Zero-compute op: for small N the pallas_call launch + glue dwarfs
            # the few-KiB copy that XLA's stack already does at roofline.
            b = jnp.stack([lower, upper], axis=0)
        return (b, None)

    def __call__(self, bounds, assignment):
        return self.forward(bounds, assignment)

    def __str__(self):
        return f"[{self.sub_id}] Flatten {self.idx}"


if __name__ == "__main__":
    key = jax.random.PRNGKey(0)
    k_lo, k_up = jax.random.split(key)

    # NCHW bounds tensors (lower / upper), small shapes.
    B, C, H, W = 2, 4, 16, 16
    lower = jax.random.normal(k_lo, (B, C, H, W), dtype=jnp.float32)
    # Ensure upper >= lower (as for real interval bounds).
    upper = lower + jnp.abs(jax.random.normal(k_up, (B, C, H, W), dtype=jnp.float32))

    # force_pallas so the small demo exercises the Pallas kernel path.
    layer = FlattenTransformer(last=None, idx=0, sub_id=0, force_pallas=True)
    out, none_part = layer((lower, upper), assignment=None)
    out = jax.block_until_ready(out)

    # Reference check against plain JAX (mirrors torch.stack of flattens).
    ref = jnp.stack([lower.reshape(-1), upper.reshape(-1)], axis=0)
    assert out.shape == (2, B * C * H * W), out.shape
    assert none_part is None
    assert bool(jnp.all(out == ref)), "mismatch vs reference"

    print("KERNEL_OK")
</pallas_src>

<mosaic_0001>
module attributes {stable_mosaic.version = 11 : i64} {
  func.func @_stack_kernel(%arg0: i32, %arg1: memref<4x512xf32, #tpu.memory_space<vmem>>, %arg2: memref<4x512xf32, #tpu.memory_space<vmem>>, %arg3: memref<2x4x512xf32, #tpu.memory_space<vmem>>) attributes {dimension_semantics = [#tpu.dimension_semantics<parallel>], iteration_bounds = array<i64: 1>, scalar_prefetch = 0 : i64, scratch_operands = 0 : i64, tpu.core_type = #tpu.core_type<tc>, window_params = [{transform_indices = @transform_0, window_bounds = array<i64: 4, 512>}, {transform_indices = @transform_1, window_bounds = array<i64: 4, 512>}, {transform_indices = @transform_2, window_bounds = array<i64: 2, 4, 512>}]} {
    %c0 = arith.constant 0 : index
    %c0_0 = arith.constant 0 : index
    %0 = vector.load %arg1[%c0, %c0_0] : memref<4x512xf32, #tpu.memory_space<vmem>>, vector<4x512xf32>
    %c0_1 = arith.constant 0 : index
    %c0_2 = arith.constant 0 : index
    %c0_3 = arith.constant 0 : index
    %1 = vector.load %arg3[%c0_1, %c0_2, %c0_3] : memref<2x4x512xf32, #tpu.memory_space<vmem>>, vector<1x4x512xf32>
    %2 = vector.shape_cast %1 : vector<1x4x512xf32> to vector<4x512xf32>
    %3 = vector.shape_cast %0 : vector<4x512xf32> to vector<1x4x512xf32>
    tpu.vector_store %arg3[%c0_1, %c0_2, %c0_3], %3 {strides = array<i32>} : memref<2x4x512xf32, #tpu.memory_space<vmem>>, vector<1x4x512xf32>,
    %c0_4 = arith.constant 0 : index
    %c0_5 = arith.constant 0 : index
    %4 = vector.load %arg2[%c0_4, %c0_5] : memref<4x512xf32, #tpu.memory_space<vmem>>, vector<4x512xf32>
    %c1 = arith.constant 1 : index
    %c0_6 = arith.constant 0 : index
    %c0_7 = arith.constant 0 : index
    %5 = vector.load %arg3[%c1, %c0_6, %c0_7] : memref<2x4x512xf32, #tpu.memory_space<vmem>>, vector<1x4x512xf32>
    %6 = vector.shape_cast %5 : vector<1x4x512xf32> to vector<4x512xf32>
    %7 = vector.shape_cast %4 : vector<4x512xf32> to vector<1x4x512xf32>
    tpu.vector_store %arg3[%c1, %c0_6, %c0_7], %7 {strides = array<i32>} : memref<2x4x512xf32, #tpu.memory_space<vmem>>, vector<1x4x512xf32>,
    return
  }
  func.func @transform_0(%arg0: i32) -> (i32, i32) {
    %c0_i32 = arith.constant 0 : i32
    %c0_i32_0 = arith.constant 0 : i32
    return %arg0, %c0_i32 : i32, i32
  }
  func.func @transform_1(%arg0: i32) -> (i32, i32) {
    %c0_i32 = arith.constant 0 : i32
    %c0_i32_0 = arith.constant 0 : i32
    return %arg0, %c0_i32 : i32, i32
  }
  func.func @transform_2(%arg0: i32) -> (i32, i32, i32) {
    %c0_i32 = arith.constant 0 : i32
    %c0_i32_0 = arith.constant 0 : i32
    %c0_i32_1 = arith.constant 0 : i32
    return %c0_i32, %arg0, %c0_i32_0 : i32, i32, i32
  }
}

</mosaic_0001>

<bundles_post_ra>
// kernel: tpu_custom_call.1
= control target key start
LH: loop header
LB: loop body
LE: loop exit
PB: predicated region body
PF: predicated region fallthrough
CT: control target
= control target key end

     0   :  { %7 = vsyncpa [#allocation3], 0  ;;  %s196_s0 = inlined_call_operand.hbm [shape: f32[4,512], index: 0, kind: input, shape index: {}]   ;;  %s197_s1 = inlined_call_operand.hbm [shape: f32[4,512], index: 1, kind: input, shape index: {}]   ;;  %s198_s2 = inlined_call_operand.hbm [shape: f32[2,4,512], index: 2, kind: output, shape index: {}]  }
   0x1   :  { %8 = vsyncpa [#allocation6], 0 }
   0x2   :  { %9 = vsyncpa [#allocation4], 0  ;;  %s140_s9 = smov [#allocation2]   ;;  %s141_s11 = smov [#allocation5]  }
   0x3   :  { %s16_s10 = sshll.u32 %s140_s9, 4  ;;  %s26_s12 = sshll.u32 %s141_s11, 4  ;;  %s17_s10 = int_to_ptr.vmem [resolvable:$true] %s16_s10  ;;  %s27_s12 = int_to_ptr.vmem [resolvable:$true] %s26_s12 }
   0x4   :  { %s68_s15 = scalar_lea.hbm %s196_s0, 256 }
   0x5   :  { %p69_p0 = scmp.ne.s32.totalorder %s196_s0, %s68_s15  ;;  %p72_p1 = scmp.lt.u32.totalorder %s68_s15, %s196_s0 }
   0x7   :  { %p74_p2 = pnand %p72_p1, %p69_p0 }
   0x9   :  { %77 = shalt.err (!%p74_p2)
}
   0xa   :  { %s78_s20 = scalar_lea.vmem %s17_s10, 256  ;;  %p83_p4 = scmp.lt.s32.totalorder %s17_s10, %s17_s10 }
   0xb   :  { %p79_p3 = scmp.ne.s32.totalorder %s17_s10, %s78_s20  ;;  %p84_p5 = scmp.lt.s32.totalorder %s78_s20, %s78_s20 }
   0xd   :  { %p85_p6 = por %p84_p5, %p83_p4 }
   0xf   :  { %p86_p7 = pnand %p85_p6, %p79_p3 }
  0x11   :  { %89 = shalt.err (!%p86_p7)
}
  0x12   :  { %19 = dma.hbm_to_vmem [thread:$0]  %s196_s0, 256, %s17_s10, [#allocation3]  }
  0x13   :  { %s90_s25 = scalar_lea.hbm %s197_s1, 256 }
  0x14   :  { %p91_p8 = scmp.ne.s32.totalorder %s197_s1, %s90_s25  ;;  %p94_p9 = scmp.lt.u32.totalorder %s90_s25, %s197_s1 }
  0x16   :  { %p96_p10 = pnand %p94_p9, %p91_p8 }
  0x18   :  { %99 = shalt.err (!%p96_p10)
}
  0x19   :  { %s100_s30 = scalar_lea.vmem %s27_s12, 256  ;;  %p105_p12 = scmp.lt.s32.totalorder %s27_s12, %s27_s12 }
  0x1a   :  { %p101_p11 = scmp.ne.s32.totalorder %s27_s12, %s100_s30  ;;  %p106_p13 = scmp.lt.s32.totalorder %s100_s30, %s100_s30 }
  0x1c   :  { %p107_p0 = por %p106_p13, %p105_p12 }
  0x1e   :  { %p108_p1 = pnand %p107_p0, %p101_p11 }
  0x20   :  { %111 = shalt.err (!%p108_p1)
}
  0x21   :  { %29 = dma.hbm_to_vmem [thread:$0]  %s197_s1, 256, %s27_s12, [#allocation6]  }
  0x22   :  { %134 = dma.done.wait [#allocation3], 256  }
  0x23   :  { %135 = vsyncadd [#allocation3], 4294967040 }
  0x24   :  { %136 = dma.done.wait [#allocation6], 256  }
  0x25   :  { %137 = vsyncadd [#allocation6], 4294967040  ;;  %s142_s4 = smov [#allocation7]   ;;  %v36_v0 = vld [vmem:[#allocation2] sm:$0xff]  ;;  %v37_v1 = vld [vmem:[#allocation2 + $0x8] sm:$0xff] }
  0x26   :  { %s50_s5 = sshll.u32 %s142_s4, 4  ;;  %v40_v2 = vld [vmem:[#allocation5] sm:$0xff]  ;;  %38 = vst [vmem:[#allocation7] sm:$0xff] %v36_v0  ;;  %39 = vst [vmem:[#allocation7 + $0x8] sm:$0xff] %v37_v1  ;;  %v41_v3 = vld [vmem:[#allocation5 + $0x8] sm:$0xff]  ;;  %s51_s5 = int_to_ptr.vmem [resolvable:$true] %s50_s5 }
  0x27   :  { %43 = vst [vmem:[#allocation7 + $0x10] sm:$0xff] %v40_v2  ;;  %44 = vst [vmem:[#allocation7 + $0x18] sm:$0xff] %v41_v3  ;;  %s112_s6 = scalar_lea.vmem %s51_s5, 512  ;;  %p117_p3 = scmp.lt.s32.totalorder %s51_s5, %s51_s5 }
  0x28   :  { %p113_p2 = scmp.ne.s32.totalorder %s51_s5, %s112_s6  ;;  %p118_p4 = scmp.lt.s32.totalorder %s112_s6, %s112_s6 }
  0x2a   :  { %p119_p5 = por %p118_p4, %p117_p3 }
  0x2c   :  { %p120_p6 = pnand %p119_p5, %p113_p2 }
  0x2e   :  { %123 = shalt.err (!%p120_p6)
}
  0x2f   :  { %s124_s8 = scalar_lea.hbm %s198_s2, 512 }
  0x30   :  { %p125_p7 = scmp.ne.s32.totalorder %s198_s2, %s124_s8  ;;  %p128_p8 = scmp.lt.u32.totalorder %s124_s8, %s198_s2 }
  0x32   :  { %p130_p9 = pnand %p128_p8, %p125_p7 }
  0x34   :  { %133 = shalt.err (!%p130_p9)
}
  0x35   :  { %s143_s13 = smov 256   ;;  %s144_s14 = smov 16  }
  0x36   :  { %56 = dma.vmem_to_hbm [thread:$0]  %s51_s5, 512, %s198_s2, [#allocation4], %s143_s13, %s143_s13, %s144_s14  }
  0x37   :  { %138 = dma.done.wait [#allocation4], 512  }
  0x38   :  { %139 = vsyncadd [#allocation4], 4294966784 }
  0x39   :  { %60 = vsyncpa [#allocation3], 1 }
  0x3a   :  { %61 = vsyncpa [#allocation6], 1 }
  0x3b   :  { %62 = vsyncpa [#allocation4], 1 }

</bundles_post_ra>
